<compile_context>
chip_gen: v7x
topology: tpu7x:2x2x1
jax: 0.10.0
libtpu: 0.0.40
codegen_flags: <defaults>
</compile_context>

<pallas_src>
import functools
import math

import jax
import jax.numpy as jnp
from jax.experimental import pallas as pl
from jax.experimental.pallas import tpu as pltpu


def _round_up(v, m):
    return ((v + m - 1) // m) * m


def _noisy_linear_kernel(x_ref, wm_ref, ws_ref, wn_ref, bm_ref, bs_ref, bn_ref,
                         o_ref, acc_ref, *, compute_dtype):
    k = pl.program_id(2)

    @pl.when(k == 0)
    def _():
        acc_ref[...] = jnp.zeros_like(acc_ref)

    # Noisy-weight construction in the native dtype on the VPU (v5e has no
    # bf16 VPU ops, so keep elementwise math in f32 and cast only for the MXU).
    w = wm_ref[...] + ws_ref[...] * wn_ref[...]        # (bn, bk)
    x = x_ref[...]                                     # (bb, bk)
    if compute_dtype is not None:
        w = w.astype(compute_dtype)
        x = x.astype(compute_dtype)

    # Contract the shared K axis (axis 1 of both) -> (bb, bn); no w.T transpose.
    acc_ref[...] += jax.lax.dot_general(
        x, w,
        dimension_numbers=(((1,), (1,)), ((), ())),
        preferred_element_type=jnp.float32)

    @pl.when(k == pl.num_programs(2) - 1)
    def _():
        b = bm_ref[...] + bs_ref[...] * bn_ref[...]    # (1, bn)
        o_ref[...] = (acc_ref[...] + b.astype(jnp.float32)).astype(o_ref.dtype)


def noisy_linear(x, weight_mean, weight_std, weight_noise,
                 bias_mean, bias_std, bias_noise, *,
                 block_b=256, block_n=256, block_k=512,
                 compute_dtype=None):
    """Pallas NoisyLinear forward (training mode).

    x:            [B, in_features]
    weight_*:     [out_features, in_features]   (PyTorch layout)
    bias_*:       [out_features]
    compute_dtype: e.g. jnp.bfloat16 to feed the MXU in bf16 (f32 accumulate).
    returns:      [B, out_features] in x.dtype
    """
    B, K = x.shape
    N, K2 = weight_mean.shape
    assert K == K2, "in_features mismatch"

    # Clamp tile sizes to the (padded) problem and keep TPU-friendly alignment:
    # second-minor dims multiples of 8, minor dims multiples of 128.
    block_b = min(block_b, _round_up(B, 8))
    block_n = min(block_n, _round_up(N, 128))
    block_k = min(block_k, _round_up(K, 128))

    Bp = _round_up(B, block_b)
    Np = _round_up(N, block_n)
    Kp = _round_up(K, block_k)

    # Zero-pad to tile boundaries (exact: padded columns contribute nothing,
    # padded output rows/cols are sliced off below).
    xp = x if (Bp == B and Kp == K) else jnp.pad(x, ((0, Bp - B), (0, Kp - K)))

    def pad_w(w):
        return w if (Np == N and Kp == K) else jnp.pad(w, ((0, Np - N), (0, Kp - K)))

    def pad_b(b):
        b = b if Np == N else jnp.pad(b, ((0, Np - N),))
        return b.reshape(1, Np)

    wm, ws, wn = pad_w(weight_mean), pad_w(weight_std), pad_w(weight_noise)
    bm, bs, bn = pad_b(bias_mean), pad_b(bias_std), pad_b(bias_noise)

    grid = (Bp // block_b, Np // block_n, Kp // block_k)

    x_spec = pl.BlockSpec((block_b, block_k), lambda i, j, k: (i, k))
    w_spec = pl.BlockSpec((block_n, block_k), lambda i, j, k: (j, k))
    b_spec = pl.BlockSpec((1, block_n), lambda i, j, k: (0, j))
    o_spec = pl.BlockSpec((block_b, block_n), lambda i, j, k: (i, j))

    kernel = functools.partial(_noisy_linear_kernel, compute_dtype=compute_dtype)

    out_p = pl.pallas_call(
        kernel,
        out_shape=jax.ShapeDtypeStruct((Bp, Np), x.dtype),
        grid_spec=pltpu.PrefetchScalarGridSpec(
            num_scalar_prefetch=0,
            grid=grid,
            in_specs=[
                x_spec,                   # x
                w_spec, w_spec, w_spec,   # weight_mean / std / noise
                b_spec, b_spec, b_spec,   # bias_mean / std / noise
            ],
            out_specs=o_spec,
            scratch_shapes=[pltpu.VMEM((block_b, block_n), jnp.float32)],
        ),
        compiler_params=pltpu.CompilerParams(
            dimension_semantics=("parallel", "parallel", "arbitrary")),
    )(xp, wm, ws, wn, bm, bs, bn)

    return out_p[:B, :N]


def init_noisy_linear_params(key, in_features, out_features, dtype=jnp.float32):
    """Deterministic init mirroring NoisyLinear.reset_parameters / reset_noise."""
    k_wm, k_bm, k_wn = jax.random.split(key, 3)
    r_param = math.sqrt(3.0 / in_features)
    r_noise = math.sqrt(1.0 / out_features)
    weight_mean = jax.random.uniform(k_wm, (out_features, in_features),
                                     dtype, -r_param, r_param)
    weight_std = jnp.full((out_features, in_features), 0.017, dtype)
    bias_mean = jax.random.uniform(k_bm, (out_features,), dtype,
                                   -r_param, r_param)
    bias_std = jnp.full((out_features,), 0.017, dtype)
    weight_noise = jax.random.uniform(k_wn, (out_features, in_features),
                                      dtype, -r_noise, r_noise)
    bias_noise = jnp.full((out_features,), 0.5 * r_noise, dtype)
    return (weight_mean, weight_std, weight_noise,
            bias_mean, bias_std, bias_noise)


if __name__ == "__main__":
    key = jax.random.PRNGKey(0)
    k_x, k_p = jax.random.split(key)

    B, IN_F, OUT_F = 8, 32, 32
    x = jax.random.normal(k_x, (B, IN_F), jnp.float32)
    (wm, ws, wn, bm, bs, bn) = init_noisy_linear_params(k_p, IN_F, OUT_F)

    # Pure-JAX reference of the PyTorch training-mode forward.
    w_ref = wm + ws * wn
    b_ref = bm + bs * bn
    ref = x @ w_ref.T + b_ref

    # f32 MXU path (exact-ish).
    out = noisy_linear(x, wm, ws, wn, bm, bs, bn)
    out = jax.block_until_ready(out)
    assert out.shape == (B, OUT_F)
    assert jnp.allclose(out, ref, atol=1e-5, rtol=1e-5), "f32 path mismatch"

    # bf16 MXU path (what you'd use on v6e/v7x); f32 accumulation.
    out_bf16 = noisy_linear(x, wm, ws, wn, bm, bs, bn,
                            compute_dtype=jnp.bfloat16)
    out_bf16 = jax.block_until_ready(out_bf16)
    assert out_bf16.shape == (B, OUT_F)
    assert jnp.allclose(out_bf16, ref, atol=5e-2, rtol=5e-2), "bf16 path mismatch"

    print("KERNEL_OK")
</pallas_src>

<mosaic_0001>
module attributes {stable_mosaic.version = 11 : i64} {
  func.func @_noisy_linear_kernel(%arg0: i32, %arg1: i32, %arg2: i32, %arg3: memref<8x128xf32, #tpu.memory_space<vmem>>, %arg4: memref<128x128xf32, #tpu.memory_space<vmem>>, %arg5: memref<128x128xf32, #tpu.memory_space<vmem>>, %arg6: memref<128x128xf32, #tpu.memory_space<vmem>>, %arg7: memref<1x128xf32, #tpu.memory_space<vmem>>, %arg8: memref<1x128xf32, #tpu.memory_space<vmem>>, %arg9: memref<1x128xf32, #tpu.memory_space<vmem>>, %arg10: memref<8x128xf32, #tpu.memory_space<vmem>>, %arg11: memref<8x128xf32, #tpu.memory_space<vmem>>) attributes {dimension_semantics = [#tpu.dimension_semantics<parallel>, #tpu.dimension_semantics<parallel>, #tpu.dimension_semantics<arbitrary>], iteration_bounds = array<i64: 1, 1, 1>, scalar_prefetch = 0 : i64, scratch_operands = 1 : i64, tpu.core_type = #tpu.core_type<tc>, window_params = [{transform_indices = @transform_0, window_bounds = array<i64: 8, 128>}, {transform_indices = @transform_1, window_bounds = array<i64: 128, 128>}, {transform_indices = @transform_2, window_bounds = array<i64: 128, 128>}, {transform_indices = @transform_3, window_bounds = array<i64: 128, 128>}, {transform_indices = @transform_4, window_bounds = array<i64: 1, 128>}, {transform_indices = @transform_5, window_bounds = array<i64: 1, 128>}, {transform_indices = @transform_6, window_bounds = array<i64: 1, 128>}, {transform_indices = @transform_7, window_bounds = array<i64: 8, 128>}]} {
    %c0_i32 = arith.constant 0 : i32
    %0 = arith.cmpi eq, %arg2, %c0_i32 : i32
    %1 = arith.extui %0 : i1 to i32
    %c0_i32_0 = arith.constant 0 : i32
    %2 = arith.cmpi ne, %1, %c0_i32_0 : i32
    scf.if %2 {
      %cst_14 = arith.constant 0.000000e+00 : f32
      %16 = vector.broadcast %cst_14 : f32 to vector<8x128xf32>
      %c0_15 = arith.constant 0 : index
      %c0_16 = arith.constant 0 : index
      %17 = vector.load %arg11[%c0_15, %c0_16] : memref<8x128xf32, #tpu.memory_space<vmem>>, vector<8x128xf32>
      tpu.vector_store %arg11[%c0_15, %c0_16], %16 {strides = array<i32>} : memref<8x128xf32, #tpu.memory_space<vmem>>, vector<8x128xf32>,
    } else {
    }
    %c0 = arith.constant 0 : index
    %c0_1 = arith.constant 0 : index
    %3 = vector.load %arg4[%c0, %c0_1] : memref<128x128xf32, #tpu.memory_space<vmem>>, vector<128x128xf32>
    %c0_2 = arith.constant 0 : index
    %c0_3 = arith.constant 0 : index
    %4 = vector.load %arg5[%c0_2, %c0_3] : memref<128x128xf32, #tpu.memory_space<vmem>>, vector<128x128xf32>
    %c0_4 = arith.constant 0 : index
    %c0_5 = arith.constant 0 : index
    %5 = vector.load %arg6[%c0_4, %c0_5] : memref<128x128xf32, #tpu.memory_space<vmem>>, vector<128x128xf32>
    %6 = arith.mulf %4, %5 : vector<128x128xf32>
    %7 = arith.addf %3, %6 : vector<128x128xf32>
    %c0_6 = arith.constant 0 : index
    %c0_7 = arith.constant 0 : index
    %8 = vector.load %arg3[%c0_6, %c0_7] : memref<8x128xf32, #tpu.memory_space<vmem>>, vector<8x128xf32>
    %c0_8 = arith.constant 0 : index
    %c0_9 = arith.constant 0 : index
    %9 = vector.load %arg11[%c0_8, %c0_9] : memref<8x128xf32, #tpu.memory_space<vmem>>, vector<8x128xf32>
    %cst = arith.constant dense<0.000000e+00> : vector<8x128xf32>
    %10 = tpu.matmul %8, %7, %cst {dimension_numbers = #tpu.dot_dimension_numbers<[1], [1], [0], [0], [0, 0, 1, 0], [], []>} : vector<8x128xf32>, vector<128x128xf32>, vector<8x128xf32> -> vector<8x128xf32>
    %11 = arith.addf %9, %10 : vector<8x128xf32>
    %c0_10 = arith.constant 0 : index
    %c0_11 = arith.constant 0 : index
    %12 = vector.load %arg11[%c0_10, %c0_11] : memref<8x128xf32, #tpu.memory_space<vmem>>, vector<8x128xf32>
    tpu.vector_store %arg11[%c0_10, %c0_11], %11 {strides = array<i32>} : memref<8x128xf32, #tpu.memory_space<vmem>>, vector<8x128xf32>,
    %c0_i32_12 = arith.constant 0 : i32
    %13 = arith.cmpi eq, %arg2, %c0_i32_12 : i32
    %14 = arith.extui %13 : i1 to i32
    %c0_i32_13 = arith.constant 0 : i32
    %15 = arith.cmpi ne, %14, %c0_i32_13 : i32
    scf.if %15 {
      %c0_14 = arith.constant 0 : index
      %c0_15 = arith.constant 0 : index
      %16 = vector.load %arg7[%c0_14, %c0_15] : memref<1x128xf32, #tpu.memory_space<vmem>>, vector<1x128xf32>
      %c0_16 = arith.constant 0 : index
      %c0_17 = arith.constant 0 : index
      %17 = vector.load %arg8[%c0_16, %c0_17] : memref<1x128xf32, #tpu.memory_space<vmem>>, vector<1x128xf32>
      %c0_18 = arith.constant 0 : index
      %c0_19 = arith.constant 0 : index
      %18 = vector.load %arg9[%c0_18, %c0_19] : memref<1x128xf32, #tpu.memory_space<vmem>>, vector<1x128xf32>
      %19 = arith.mulf %17, %18 : vector<1x128xf32>
      %20 = arith.addf %16, %19 : vector<1x128xf32>
      %c0_20 = arith.constant 0 : index
      %c0_21 = arith.constant 0 : index
      %21 = vector.load %arg11[%c0_20, %c0_21] : memref<8x128xf32, #tpu.memory_space<vmem>>, vector<8x128xf32>
      %22 = vector.broadcast %20 : vector<1x128xf32> to vector<8x128xf32>
      %23 = arith.addf %21, %22 : vector<8x128xf32>
      %c0_22 = arith.constant 0 : index
      %c0_23 = arith.constant 0 : index
      %24 = vector.load %arg10[%c0_22, %c0_23] : memref<8x128xf32, #tpu.memory_space<vmem>>, vector<8x128xf32>
      tpu.vector_store %arg10[%c0_22, %c0_23], %23 {strides = array<i32>} : memref<8x128xf32, #tpu.memory_space<vmem>>, vector<8x128xf32>,
    } else {
    }
    return
  }
  func.func @transform_0(%arg0: i32, %arg1: i32, %arg2: i32) -> (i32, i32) {
    %c0_i32 = arith.constant 0 : i32
    return %arg0, %arg2 : i32, i32
  }
  func.func @transform_1(%arg0: i32, %arg1: i32, %arg2: i32) -> (i32, i32) {
    %c0_i32 = arith.constant 0 : i32
    return %arg1, %arg2 : i32, i32
  }
  func.func @transform_2(%arg0: i32, %arg1: i32, %arg2: i32) -> (i32, i32) {
    %c0_i32 = arith.constant 0 : i32
    return %arg1, %arg2 : i32, i32
  }
  func.func @transform_3(%arg0: i32, %arg1: i32, %arg2: i32) -> (i32, i32) {
    %c0_i32 = arith.constant 0 : i32
    return %arg1, %arg2 : i32, i32
  }
  func.func @transform_4(%arg0: i32, %arg1: i32, %arg2: i32) -> (i32, i32) {
    %c0_i32 = arith.constant 0 : i32
    %c0_i32_0 = arith.constant 0 : i32
    return %c0_i32, %arg1 : i32, i32
  }
  func.func @transform_5(%arg0: i32, %arg1: i32, %arg2: i32) -> (i32, i32) {
    %c0_i32 = arith.constant 0 : i32
    %c0_i32_0 = arith.constant 0 : i32
    return %c0_i32, %arg1 : i32, i32
  }
  func.func @transform_6(%arg0: i32, %arg1: i32, %arg2: i32) -> (i32, i32) {
    %c0_i32 = arith.constant 0 : i32
    %c0_i32_0 = arith.constant 0 : i32
    return %c0_i32, %arg1 : i32, i32
  }
  func.func @transform_7(%arg0: i32, %arg1: i32, %arg2: i32) -> (i32, i32) {
    %c0_i32 = arith.constant 0 : i32
    return %arg0, %arg1 : i32, i32
  }
}

</mosaic_0001>

<bundles_post_ra>
// kernel: tpu_custom_call.1
= control target key start
LH: loop header
LB: loop body
LE: loop exit
PB: predicated region body
PF: predicated region fallthrough
CT: control target
= control target key end

     0   :  { %12 = vsyncpa [#allocation4], 0  ;;  %s613_s0 = inlined_call_operand.hbm [shape: f32[8,128], index: 0, kind: input, shape index: {}]   ;;  %s614_s1 = inlined_call_operand.hbm [shape: f32[128,128], index: 1, kind: input, shape index: {}]   ;;  %s615_s2 = inlined_call_operand.hbm [shape: f32[128,128], index: 2, kind: input, shape index: {}]   ;;  %s616_s3 = inlined_call_operand.hbm [shape: f32[128,128], index: 3, kind: input, shape index: {}]   ;;  %s617_s4 = inlined_call_operand.vmem [shape: f32[1,128], index: 4, kind: input, shape index: {}]   ;;  %s618_s5 = inlined_call_operand.vmem [shape: f32[1,128], index: 5, kind: input, shape index: {}]   ;;  %s619_s6 = inlined_call_operand.vmem [shape: f32[1,128], index: 6, kind: input, shape index: {}]   ;;  %s620_s7 = inlined_call_operand.hbm [shape: f32[8,128], index: 7, kind: output, shape index: {}]  }
   0x1   :  { %13 = vsyncpa [#allocation7], 0 }
   0x2   :  { %14 = vsyncpa [#allocation10], 0 }
   0x3   :  { %15 = vsyncpa [#allocation5], 0  ;;  %s477_s24 = smov [#allocation6]   ;;  %s359_s28 = scalar_lea.hbm %s614_s1, 2048 }
   0x4   :  { %s31_s25 = sshll.u32 %s477_s24, 4  ;;  %p360_p0 = scmp.ne.s32.totalorder %s614_s1, %s359_s28  ;;  %s32_s25 = int_to_ptr.vmem [resolvable:$true] %s31_s25 }
   0x5   :  { %p363_p1 = scmp.lt.u32.totalorder %s359_s28, %s614_s1 }
   0x7   :  { %p365_p2 = pnand %p363_p1, %p360_p0 }
   0x9   :  { %368 = shalt.err (!%p365_p2)
}
   0xa   :  { %s369_s10 = scalar_lea.vmem %s32_s25, 2048  ;;  %p374_p4 = scmp.lt.s32.totalorder %s32_s25, %s32_s25 }
   0xb   :  { %p370_p3 = scmp.ne.s32.totalorder %s32_s25, %s369_s10  ;;  %p375_p5 = scmp.lt.s32.totalorder %s369_s10, %s369_s10 }
   0xd   :  { %p376_p6 = por %p375_p5, %p374_p4 }
   0xf   :  { %p377_p7 = pnand %p376_p6, %p370_p3 }
  0x11   :  { %380 = shalt.err (!%p377_p7)
}
  0x12   :  { %s478_s11 = smov 128   ;;  %s479_s12 = smov 8  }
  0x13   :  { %37 = dma.hbm_to_vmem [thread:$0]  %s614_s1, 2048, %s32_s25, [#allocation7], %s478_s11, %s478_s11, %s479_s12  }
  0x14   :  { %s480_s15 = smov [#allocation3]   ;;  %s481_s17 = smov [#allocation8]  }
  0x15   :  { %s22_s16 = sshll.u32 %s480_s15, 4  ;;  %s43_s18 = sshll.u32 %s481_s17, 4  ;;  %s23_s16 = int_to_ptr.vmem [resolvable:$true] %s22_s16  ;;  %s44_s18 = int_to_ptr.vmem [resolvable:$true] %s43_s18 }
  0x16   :  { %s381_s21 = scalar_lea.hbm %s613_s0, 128 }
  0x17   :  { %p382_p8 = scmp.ne.s32.totalorder %s613_s0, %s381_s21  ;;  %p385_p9 = scmp.lt.u32.totalorder %s381_s21, %s613_s0 }
  0x19   :  { %p387_p10 = pnand %p385_p9, %p382_p8 }
  0x1b   :  { %390 = shalt.err (!%p387_p10)
}
  0x1c   :  { %s391_s1 = scalar_lea.vmem %s23_s16, 128  ;;  %p396_p12 = scmp.lt.s32.totalorder %s23_s16, %s23_s16 }
  0x1d   :  { %p392_p11 = scmp.ne.s32.totalorder %s23_s16, %s391_s1  ;;  %p397_p13 = scmp.lt.s32.totalorder %s391_s1, %s391_s1 }
  0x1f   :  { %p398_p0 = por %p397_p13, %p396_p12 }
  0x21   :  { %p399_p1 = pnand %p398_p0, %p392_p11 }
  0x23   :  { %402 = shalt.err (!%p399_p1)
}
  0x24   :  { %25 = dma.hbm_to_vmem [thread:$0]  %s613_s0, 128, %s23_s16, [#allocation4]  }
  0x25   :  { %s403_s30 = scalar_lea.hbm %s615_s2, 2048 }
  0x26   :  { %p404_p2 = scmp.ne.s32.totalorder %s615_s2, %s403_s30  ;;  %p407_p3 = scmp.lt.u32.totalorder %s403_s30, %s615_s2 }
  0x28   :  { %p409_p4 = pnand %p407_p3, %p404_p2 }
  0x2a   :  { %412 = shalt.err (!%p409_p4)
}
  0x2b   :  { %s413_s14 = scalar_lea.vmem %s44_s18, 2048  ;;  %p418_p6 = scmp.lt.s32.totalorder %s44_s18, %s44_s18 }
  0x2c   :  { %p414_p5 = scmp.ne.s32.totalorder %s44_s18, %s413_s14  ;;  %p419_p7 = scmp.lt.s32.totalorder %s413_s14, %s413_s14 }
  0x2e   :  { %p420_p8 = por %p419_p7, %p418_p6 }
  0x30   :  { %p421_p9 = pnand %p420_p8, %p414_p5 }
  0x32   :  { %424 = shalt.err (!%p421_p9)
}
  0x33   :  { %49 = dma.hbm_to_vmem [thread:$0]  %s615_s2, 2048, %s44_s18, [#allocation7], %s478_s11, %s478_s11, %s479_s12  }
  0x34   :  { %s482_s16 = smov [#allocation9]   ;;  %s425_s21 = scalar_lea.hbm %s616_s3, 2048 }
  0x35   :  { %s55_s17 = sshll.u32 %s482_s16, 4  ;;  %p426_p10 = scmp.ne.s32.totalorder %s616_s3, %s425_s21  ;;  %s56_s17 = int_to_ptr.vmem [resolvable:$true] %s55_s17 }
  0x36   :  { %p429_p11 = scmp.lt.u32.totalorder %s425_s21, %s616_s3 }
  0x38   :  { %p431_p12 = pnand %p429_p11, %p426_p10 }
  0x3a   :  { %434 = shalt.err (!%p431_p12)
}
  0x3b   :  { %s435_s1 = scalar_lea.vmem %s56_s17, 2048  ;;  %p440_p0 = scmp.lt.s32.totalorder %s56_s17, %s56_s17 }
  0x3c   :  { %p436_p13 = scmp.ne.s32.totalorder %s56_s17, %s435_s1  ;;  %p441_p1 = scmp.lt.s32.totalorder %s435_s1, %s435_s1 }
  0x3e   :  { %p442_p2 = por %p441_p1, %p440_p0 }
  0x40   :  { %p443_p3 = pnand %p442_p2, %p436_p13 }
  0x42   :  { %446 = shalt.err (!%p443_p3)
}
  0x43   :  { %61 = dma.hbm_to_vmem [thread:$0]  %s616_s3, 2048, %s56_s17, [#allocation10], %s478_s11, %s478_s11, %s479_s12  }
  0x44   :  { %469 = dma.done.wait [#allocation4], 128  }
  0x45   :  { %470 = vsyncadd [#allocation4], 4294967168 }
  0x46   :  { %471 = dma.done.wait [#allocation7], 4096  }
  0x47   :  { %472 = vsyncadd [#allocation7], 4294963200 }
  0x48   :  { %473 = dma.done.wait [#allocation10], 2048  }
  0x49   :  { %474 = vsyncadd [#allocation10], 4294965248  ;;  %v483_v0 = vmov 0.0|0.0   ;;  %vm484_vm0 = vmmov 0   ;;  %v485_v1 = vmov 0.0   ;;  %v85_v2 = vld [vmem:[#allocation6] sm:$0xff] }
  0x4a   :  { %325 = vmatprep.subr.bf16.mxu0 %v483_v0  ;;  %322 = vmatprep.mubr.msk.f32.mxu0 %vm484_vm0, %v485_v1  ;;  %v86_v3 = vld [vmem:[#allocation6 + $0x8] sm:$0xff]  ;;  %v101_v4 = vld [vmem:[#allocation8] sm:$0xff]  ;;  %v103_v10 = vld [vmem:[#allocation8 + $0x10] sm:$0xff]  ;;  %s486_s29 = smov [#allocation11]  }
  0x4b   :  { %v102_v5 = vld [vmem:[#allocation8 + $0x8] sm:$0xff]  ;;  %v117_v6 = vld [vmem:[#allocation9] sm:$0xff]  ;;  %v104_v11 = vld [vmem:[#allocation8 + $0x18] sm:$0xff]  ;;  %s262_s30 = sshll.u32 %s486_s29, 4  ;;  %s263_s30 = int_to_ptr.vmem [resolvable:$true] %s262_s30 }
  0x4c   :  { %v118_v7 = vld [vmem:[#allocation9 + $0x8] sm:$0xff]  ;;  %v133_v8 = vmul.f32 %v117_v6, %v101_v4  ;;  %v119_v12 = vld [vmem:[#allocation9 + $0x10] sm:$0xff]  ;;  %v120_v13 = vld [vmem:[#allocation9 + $0x18] sm:$0xff]  ;;  %p452_p5 = scmp.lt.s32.totalorder %s263_s30, %s263_s30 }
  0x4d   :  { %v134_v9 = vmul.f32 %v118_v7, %v102_v5  ;;  %v135_v16 = vmul.f32 %v119_v12, %v103_v10  ;;  %v136_v17 = vmul.f32 %v120_v13, %v104_v11  ;;  %v87_v18 = vld [vmem:[#allocation6 + $0x10] sm:$0xff]  ;;  %v88_v19 = vld [vmem:[#allocation6 + $0x18] sm:$0xff]  ;;  %v105_v23 = vld [vmem:[#allocation8 + $0x20] sm:$0xff] }
  0x4e   :  { %v149_v14 = vadd.f32 %v133_v8, %v85_v2  ;;  %v106_v24 = vld [vmem:[#allocation8 + $0x28] sm:$0xff]  ;;  %v121_v25 = vld [vmem:[#allocation9 + $0x20] sm:$0xff]  ;;  %v107_v34 = vld [vmem:[#allocation8 + $0x30] sm:$0xff] }
  0x4f   :  { %v150_v15 = vadd.f32 %v134_v9, %v86_v3  ;;  %v151_v21 = vadd.f32 %v135_v16, %v87_v18  ;;  %v152_v22 = vadd.f32 %v136_v17, %v88_v19  ;;  %v122_v26 = vld [vmem:[#allocation9 + $0x28] sm:$0xff]  ;;  %v137_v28 = vmul.f32 %v121_v25, %v105_v23  ;;  %v89_v30 = vld [vmem:[#allocation6 + $0x20] sm:$0xff]  ;;  %v108_v35 = vld [vmem:[#allocation8 + $0x38] sm:$0xff] }
  0x50   :  { %v138_v29 = vmul.f32 %v122_v26, %v106_v24  ;;  %v90_v31 = vld [vmem:[#allocation6 + $0x28] sm:$0xff]  ;;  %v123_v36 = vld [vmem:[#allocation9 + $0x30] sm:$0xff]  ;;  %v124_v37 = vld [vmem:[#allocation9 + $0x38] sm:$0xff] }
  0x51   :  { %v326_v20 = vpack.c.bf16 %v150_v15, %v149_v14  ;;  %v329_v27 = vpack.c.bf16 %v152_v22, %v151_v21  ;;  %v153_v32 = vadd.f32 %v137_v28, %v89_v30  ;;  %v139_v39 = vmul.f32 %v123_v36, %v107_v34  ;;  %v91_v41 = vld [vmem:[#allocation6 + $0x30] sm:$0xff]  ;;  %v92_v42 = vld [vmem:[#allocation6 + $0x38] sm:$0xff]  ;;  %v109_v45 = vld [vmem:[#allocation8 + $0x40] sm:$0xff] }
  0x52   :  { %v154_v33 = vadd.f32 %v138_v29, %v90_v31  ;;  %v140_v40 = vmul.f32 %v124_v37, %v108_v35  ;;  %v110_v46 = vld [vmem:[#allocation8 + $0x48] sm:$0xff]  ;;  %v125_v47 = vld [vmem:[#allocation9 + $0x40] sm:$0xff]  ;;  %v111_v56 = vld [vmem:[#allocation8 + $0x50] sm:$0xff]  ;;  %v249_v28 = vlaneseq }
  0x53   :  { %327 = vmatpush3.bf16.xpose.msra.mxu0 %v326_v20  ;;  %v155_v43 = vadd.f32 %v139_v39, %v91_v41  ;;  %v126_v48 = vld [vmem:[#allocation9 + $0x48] sm:$0xff]  ;;  %v141_v50 = vmul.f32 %v125_v47, %v109_v45  ;;  %v93_v52 = vld [vmem:[#allocation6 + $0x40] sm:$0xff]  ;;  %v112_v57 = vld [vmem:[#allocation8 + $0x58] sm:$0xff] }
  0x54   :  { %328 = vmatprep.subr.bf16.mxu0 %v483_v0  ;;  %v332_v38 = vpack.c.bf16 %v154_v33, %v153_v32  ;;  %v156_v44 = vadd.f32 %v140_v40, %v92_v42  ;;  %v142_v51 = vmul.f32 %v126_v48, %v110_v46  ;;  %v94_v53 = vld [vmem:[#allocation6 + $0x48] sm:$0xff]  ;;  %v127_v58 = vld [vmem:[#allocation9 + $0x50] sm:$0xff]  ;;  %v128_v59 = vld [vmem:[#allocation9 + $0x58] sm:$0xff]  ;;  %v250_v32 = vshrl.u32 %v249_v28, 7 }
  0x55   :  { %v157_v54 = vadd.f32 %v141_v50, %v93_v52  ;;  %v143_v61 = vmul.f32 %v127_v58, %v111_v56  ;;  %v144_v62 = vmul.f32 %v128_v59, %v112_v57  ;;  %v95_v63 = vld [vmem:[#allocation6 + $0x50] sm:$0xff]  ;;  %v96_v1 = vld [vmem:[#allocation6 + $0x58] sm:$0xff]  ;;  %v113_v4 = vld [vmem:[#allocation8 + $0x60] sm:$0xff] }
  0x56   :  { %v335_v49 = vpack.c.bf16 %v156_v44, %v155_v43  ;;  %v158_v55 = vadd.f32 %v142_v51, %v94_v53  ;;  %v114_v5 = vld [vmem:[#allocation8 + $0x68] sm:$0xff]  ;;  %v129_v6 = vld [vmem:[#allocation9 + $0x60] sm:$0xff]  ;;  %v115_v15 = vld [vmem:[#allocation8 + $0x70] sm:$0xff]  ;;  %v251_v34 = vsub.s32 0, %v250_v32 }
  0x57   :  { %v159_v2 = vadd.f32 %v143_v61, %v95_v63  ;;  %v160_v3 = vadd.f32 %v144_v62, %v96_v1  ;;  %v130_v7 = vld [vmem:[#allocation9 + $0x68] sm:$0xff]  ;;  %v145_v9 = vmul.f32 %v129_v6, %v113_v4  ;;  %v97_v11 = vld [vmem:[#allocation6 + $0x60] sm:$0xff]  ;;  %v116_v16 = vld [vmem:[#allocation8 + $0x78] sm:$0xff] }
  0x58   :  { %v338_v60 = vpack.c.bf16 %v158_v55, %v157_v54  ;;  %v146_v10 = vmul.f32 %v130_v7, %v114_v5  ;;  %v98_v12 = vld [vmem:[#allocation6 + $0x68] sm:$0xff]  ;;  %v131_v17 = vld [vmem:[#allocation9 + $0x70] sm:$0xff]  ;;  %v132_v18 = vld [vmem:[#allocation9 + $0x78] sm:$0xff] }
  0x59   :  { %v341_v8 = vpack.c.bf16 %v160_v3, %v159_v2  ;;  %v161_v13 = vadd.f32 %v145_v9, %v97_v11  ;;  %v147_v20 = vmul.f32 %v131_v17, %v115_v15  ;;  %v148_v21 = vmul.f32 %v132_v18, %v116_v16  ;;  %v99_v22 = vld [vmem:[#allocation6 + $0x70] sm:$0xff]  ;;  %v100_v23 = vld [vmem:[#allocation6 + $0x78] sm:$0xff] }
  0x5a   :  { %v162_v14 = vadd.f32 %v146_v10, %v98_v12  ;;  %v243_v29 = vld [vmem:[%s618_s5] sm:$0x1]  ;;  %s447_s5 = scalar_lea.vmem %s263_s30, 128 }
  0x5b   :  { %330 = vmatpush3.bf16.xpose.msra.mxu0 %v329_v27  ;;  %v163_v24 = vadd.f32 %v147_v20, %v99_v22  ;;  %v164_v25 = vadd.f32 %v148_v21, %v100_v23  ;;  %v165_v27 = vld [vmem:[#allocation3] sm:$0xff]  ;;  %p448_p4 = scmp.ne.s32.totalorder %s263_s30, %s447_s5  ;;  %p453_p6 = scmp.lt.s32.totalorder %s447_s5, %s447_s5 }
  0x5c   :  { %331 = vmatprep.subr.bf16.mxu0 %v483_v0  ;;  %v344_v19 = vpack.c.bf16 %v162_v14, %v161_v13  ;;  %v244_v30 = vld [vmem:[%s619_s6] sm:$0x1] }
  0x5d   :  { %v347_v26 = vpack.c.bf16 %v164_v25, %v163_v24  ;;  %v245_v31 = vmul.f32 %v244_v30, %v243_v29  ;;  %v242_v33 = vld [vmem:[%s617_s4] sm:$0x1]  ;;  %p454_p7 = por %p453_p6, %p452_p5 }
  0x5f   :  { %p455_p8 = pnand %p454_p7, %p448_p4 }
  0x63   :  { %333 = vmatpush3.bf16.xpose.msra.mxu0 %v332_v38 }
  0x64   :  { %334 = vmatprep.subr.bf16.mxu0 %v483_v0 }
  0x6b   :  { %336 = vmatpush3.bf16.xpose.msra.mxu0 %v335_v49 }
  0x6c   :  { %337 = vmatprep.subr.bf16.mxu0 %v483_v0 }
  0x73   :  { %339 = vmatpush3.bf16.xpose.msra.mxu0 %v338_v60 }
  0x74   :  { %340 = vmatprep.subr.bf16.mxu0 %v483_v0 }
  0x7b   :  { %342 = vmatpush3.bf16.xpose.msra.mxu0 %v341_v8 }
  0x7c   :  { %343 = vmatprep.subr.bf16.mxu0 %v483_v0 }
  0x83   :  { %345 = vmatpush3.bf16.xpose.msra.mxu0 %v344_v19 }
  0x84   :  { %346 = vmatprep.subr.bf16.mxu0 %v483_v0  ;;  %v246_v0 = vadd.f32 %v245_v31, %v242_v33 }
  0x86   :  { %v252_v35 = vrot.slane %v246_v0, %v251_v34 }
  0x8b   :  { %348 = vmatpush3.bf16.xpose.msra.mxu0 %v347_v26 }
  0x92   :  { %323 = vmatmul.mubr.f32.vlgmr.msra.gmra.mrb[0].mxu0 %v165_v27 }
 0x165   :  { %v233_v36 = vpop.f32.mrb[0].mxu0 }
 0x166   :  { %v254_v37 = vadd.f32 %v252_v35, %v233_v36  ;;  %v324_v38 = vpop.f32.mrb[1].mxu0 }
 0x168   :  { %255 = vst [vmem:[#allocation11] sm:$0xff] %v254_v37 }
 0x169   :  { %458 = shalt.err (!%p455_p8)
}
 0x16a   :  { %s459_s4 = scalar_lea.hbm %s620_s7, 128 }
 0x16b   :  { %p460_p9 = scmp.ne.s32.totalorder %s620_s7, %s459_s4  ;;  %p463_p10 = scmp.lt.u32.totalorder %s459_s4, %s620_s7 }
 0x16d   :  { %p465_p11 = pnand %p463_p10, %p460_p9 }
 0x16f   :  { %468 = shalt.err (!%p465_p11)
}
 0x170   :  { %265 = dma.vmem_to_hbm [thread:$0]  %s263_s30, 128, %s620_s7, [#allocation5]  }
 0x171   :  { %475 = dma.done.wait [#allocation5], 128  }
 0x172   :  { %476 = vsyncadd [#allocation5], 4294967168 }
 0x173   :  { %269 = vsyncpa [#allocation4], 1 }
 0x174   :  { %270 = vsyncpa [#allocation7], 1 }
 0x175   :  { %271 = vsyncpa [#allocation10], 1 }
 0x176   :  { %272 = vsyncpa [#allocation5], 1 }

</bundles_post_ra>
